<compile_context>
chip_gen: v6e
topology: v6e:2x2x1
jax: 0.10.0
libtpu: 0.0.40
codegen_flags: <defaults>
</compile_context>

<pallas_src>
import functools

import jax
import jax.numpy as jnp
from jax import lax
from jax.experimental import pallas as pl
from jax.experimental.pallas import tpu as pltpu


def down_kernel(x_ref, w1_ref, b1_ref, w2_ref, b2_ref, o_ref, *, Bb, Ho):
    # x_ref: (Bb, 4, Ho, Wo*Cin) bf16; axis 1 holds the four 2x2 pool taps,
    # lanes hold (w_out, c).  The max-pool is a pure VPU elementwise max.
    pooled = jnp.max(x_ref[...], axis=1)                     # (Bb, Ho, Wo*Cin)

    def conv_bias_relu(h, w_ref, b_ref):
        # h: (Bb, Ho, L_in) bf16, W folded into lanes.
        # 3x3 conv (SAME) as three banded MXU matmuls, one per dy row shift.
        # dx / the x zero-padding live inside the banded RHS (built once in
        # the wrapper), so there is no lane concat and no halo scratch here.
        L_in = h.shape[-1]
        zrow = jnp.zeros((Bb, 1, L_in), h.dtype)
        rows = (jnp.concatenate([zrow, h[:, :-1, :]], axis=1),   # row y-1
                h,                                               # row y
                jnp.concatenate([h[:, 1:, :], zrow], axis=1))    # row y+1
        acc = jnp.dot(rows[0].reshape(Bb * Ho, L_in), w_ref[0],
                      preferred_element_type=jnp.float32)
        for dy in (1, 2):
            acc = acc + jnp.dot(rows[dy].reshape(Bb * Ho, L_in), w_ref[dy],
                                preferred_element_type=jnp.float32)
        # BN scale is already folded into the weights; epilogue is bias + ReLU.
        return jnp.maximum(acc + b_ref[...], 0.0)            # (Bb*Ho, L_out) f32

    h1 = conv_bias_relu(pooled, w1_ref, b1_ref)
    h1 = h1.astype(jnp.bfloat16).reshape(Bb, Ho, -1)
    h2 = conv_bias_relu(h1, w2_ref, b2_ref)
    o_ref[...] = h2.reshape(o_ref.shape).astype(o_ref.dtype)


def _banded_conv_weight(w_hwio, bn_scale, Wo):
    """(3,3,Cin,Cout) HWIO conv weight, with the eval-BN scale folded in,
    rearranged into the W-folded banded matmul RHS (3, Wo*Cin, Wo*Cout) bf16.

    band[dy][x_in*Cin+ci, x_out*Cout+co] = scale[co] * w[dy, x_in-x_out+1, ci, co]
    for |x_in - x_out| <= 1, zero otherwise (== the conv's SAME padding in x).
    """
    _, _, cin, cout = w_hwio.shape
    w = w_hwio * bn_scale[None, None, None, :]
    bands = []
    for dy in range(3):
        band = jnp.zeros((Wo, cin, Wo, cout), jnp.float32)
        for dx in range(3):
            diag = jnp.eye(Wo, k=1 - dx, dtype=jnp.float32)   # [x_in, x_out]
            band = band + jnp.einsum('io,cd->icod', diag, w[dy, dx])
        bands.append(band.reshape(Wo * cin, Wo * cout))
    return jnp.stack(bands).astype(jnp.bfloat16)


def _pad_up(n, m):
    return -(-n // m) * m


def _tpu_budget():
    """(physical VMEM bytes, TensorCores per chip) with conservative fallbacks."""
    vmem_cap, cores = 64 * 2 ** 20, 1          # v7x-sized VMEM if query fails
    try:
        info = pltpu.get_tpu_info()
        vmem_cap = int(getattr(info, "vmem_capacity_bytes", vmem_cap))
        cores = int(getattr(info, "num_cores",
                            getattr(info, "core_count", cores)))
    except Exception:
        pass
    return vmem_cap, max(1, cores)


def _block_footprint(b, Ho, Lin, L1, L2):
    """Layout-padded VMEM bytes per grid step: double-buffered in/out blocks,
    resident weights/biases and the main in-kernel temporaries."""
    in_blk = b * 4 * _pad_up(Ho, 16) * _pad_up(Lin, 128) * 2           # bf16
    out_blk = b * _pad_up(Ho, 8) * _pad_up(L2, 128) * 4                # f32
    weights = 2 * (3 * _pad_up(Lin, 16) * _pad_up(L1, 128)
                   + 3 * _pad_up(L1, 16) * _pad_up(L2, 128))           # bf16
    biases = 8 * (_pad_up(L1, 128) + _pad_up(L2, 128)) * 4
    temps = b * _pad_up(Ho, 8) * (3 * _pad_up(Lin, 128) * 2
                                  + 3 * _pad_up(L1, 128) * 2
                                  + _pad_up(L1, 128) * 4
                                  + _pad_up(L2, 128) * 4)
    return 2 * (in_blk + out_blk) + 2 * (weights + biases) + temps


def _choose_batch_block(N, Ho, Lin, L1, L2, vmem_cap, num_cores):
    # Target ~512 matmul rows (M = B*Ho) per step to amortize the ~0.35 us
    # fixed per-step cost.  Only force multiple grid steps on multi-TC chips
    # (v7x); on v5e/v6e the grid is a serial loop and splitting just adds
    # overhead.
    b = max(1, min(N, _pad_up(512, Ho) // Ho))
    if num_cores > 1:
        while b > 1 and -(-N // b) < num_cores:
            b -= 1
    budget = int(0.55 * vmem_cap)
    while b > 1 and _block_footprint(b, Ho, Lin, L1, L2) > budget:
        b -= 1
    return b


def down_forward(x_nchw, w1, s1, b1, w2, s2, b2):
    """Down.forward (eval mode).  x_nchw: (N, Cin, H, W) f32; conv weights in
    HWIO; (s, b) = BN running stats + affine + conv bias folded to per-channel
    scale/bias.  Returns (N, Cout, H//2, W//2) f32."""
    N, Cin, H, W = x_nchw.shape
    Cout = w1.shape[-1]
    assert H % 2 == 0 and W % 2 == 0
    Ho, Wo = H // 2, W // 2
    Lin, L1, L2 = Wo * Cin, Wo * Cout, Wo * Cout

    # NCHW -> lane-dense pooling layout (N, 4, Ho, Wo*Cin).  One fused XLA
    # transpose (needed anyway to leave NCHW); bf16 halves DMA bytes and is
    # exact through the max-pool (rounding is monotone).
    x = jnp.transpose(x_nchw, (0, 2, 3, 1))            # (N, H, W, Cin)
    x = x.reshape(N, Ho, 2, Wo, 2, Cin)
    x = jnp.transpose(x, (0, 2, 4, 1, 3, 5))           # (N, hp, wp, Ho, Wo, Cin)
    x = x.reshape(N, 4, Ho, Lin).astype(jnp.bfloat16)

    # Banded MXU RHS per conv (BN scale folded into the bf16 weights); biases
    # broadcast to the lane-dense (x_out, co) output layout.
    w1b = _banded_conv_weight(w1, s1, Wo)              # (3, Lin, L1)
    w2b = _banded_conv_weight(w2, s2, Wo)              # (3, L1, L2)
    b1l = jnp.tile(b1, Wo).reshape(1, L1).astype(jnp.float32)
    b2l = jnp.tile(b2, Wo).reshape(1, L2).astype(jnp.float32)

    vmem_cap, num_cores = _tpu_budget()
    Bb = _choose_batch_block(N, Ho, Lin, L1, L2, vmem_cap, num_cores)
    Np = _pad_up(N, Bb)
    if Np != N:
        x = jnp.pad(x, ((0, Np - N), (0, 0), (0, 0), (0, 0)))

    footprint = _block_footprint(Bb, Ho, Lin, L1, L2)
    vmem_limit = int(min(0.8 * vmem_cap, max(32 * 2 ** 20, 1.3 * footprint)))

    kernel = functools.partial(down_kernel, Bb=Bb, Ho=Ho)
    out = pl.pallas_call(
        kernel,
        out_shape=jax.ShapeDtypeStruct((Np, Ho, L2), jnp.float32),
        grid_spec=pltpu.PrefetchScalarGridSpec(
            num_scalar_prefetch=0,
            grid=(Np // Bb,),
            in_specs=[
                pl.BlockSpec((Bb, 4, Ho, Lin), lambda n: (n, 0, 0, 0)),
                pl.BlockSpec((3, Lin, L1), lambda n: (0, 0, 0)),
                pl.BlockSpec((1, L1), lambda n: (0, 0)),
                pl.BlockSpec((3, L1, L2), lambda n: (0, 0, 0)),
                pl.BlockSpec((1, L2), lambda n: (0, 0)),
            ],
            out_specs=pl.BlockSpec((Bb, Ho, L2), lambda n: (n, 0, 0)),
        ),
        compiler_params=pltpu.CompilerParams(
            dimension_semantics=("parallel",),    # no cross-step state -> safe
            vmem_limit_bytes=vmem_limit),
    )(x, w1b, b1l, w2b, b2l)

    # Unfold lanes and return in the module's NCHW interface.
    # TODO(synk): callers that stay channels-last could skip this transpose
    #             (and take bf16 output) to save a full HBM pass.
    out = out[:N].reshape(N, Ho, Wo, Cout)
    return jnp.transpose(out, (0, 3, 1, 2))


def make_params(key, in_ch, out_ch, eps=1e-5):
    """Deterministic synthetic parameters.  Returns folded (w, scale, bias)
    per conv+BN pair plus the raw params for the reference check."""
    ks = jax.random.split(key, 12)

    def conv_bn(kw, kb, kg, kbe, km, kv, cin, cout):
        w = 0.1 * jax.random.normal(kw, (3, 3, cin, cout), jnp.float32)  # HWIO
        cb = 0.05 * jax.random.normal(kb, (cout,), jnp.float32)
        gamma = 1.0 + 0.1 * jax.random.normal(kg, (cout,), jnp.float32)
        beta = 0.1 * jax.random.normal(kbe, (cout,), jnp.float32)
        mean = 0.05 * jax.random.normal(km, (cout,), jnp.float32)
        var = 0.5 + jnp.abs(jax.random.normal(kv, (cout,), jnp.float32))
        scale = gamma / jnp.sqrt(var + eps)
        bias = (cb - mean) * scale + beta
        return (w, scale, bias), (w, cb, gamma, beta, mean, var)

    (w1, s1, b1), raw1 = conv_bn(*ks[0:6], in_ch, out_ch)
    (w2, s2, b2), raw2 = conv_bn(*ks[6:12], out_ch, out_ch)
    return (w1, s1, b1, w2, s2, b2), raw1 + raw2


def reference(x_nchw, raw, eps=1e-5):
    """Eval-mode Down forward from raw conv/BN params.  The BN scale is folded
    into the conv weight *before* the bf16 cast (same MXU precision choice as
    the kernel) so the comparison is tight."""
    (w1, cb1, g1, be1, m1, v1, w2, cb2, g2, be2, m2, v2) = raw
    x = jnp.transpose(x_nchw, (0, 2, 3, 1))
    N, H, W, C = x.shape
    h = x.reshape(N, H // 2, 2, W // 2, 2, C).max(axis=(2, 4))

    def conv_bn_relu(h, w, cb, g, be, m, v):
        scale = g / jnp.sqrt(v + eps)
        y = lax.conv_general_dilated(
            h.astype(jnp.bfloat16), (w * scale).astype(jnp.bfloat16),
            window_strides=(1, 1), padding="SAME",
            dimension_numbers=("NHWC", "HWIO", "NHWC"),
            preferred_element_type=jnp.float32)
        y = y + (cb - m) * scale + be
        return jnp.maximum(y, 0.0)

    h = conv_bn_relu(h, w1, cb1, g1, be1, m1, v1)
    h = conv_bn_relu(h, w2, cb2, g2, be2, m2, v2)
    return jnp.transpose(h, (0, 3, 1, 2))


if __name__ == "__main__":
    key = jax.random.PRNGKey(0)
    kx, kp = jax.random.split(key)

    N, Cin, H, W = 2, 4, 16, 16
    Cout = 8
    x = jax.random.normal(kx, (N, Cin, H, W), jnp.float32)

    (w1, s1, b1, w2, s2, b2), raw = make_params(kp, Cin, Cout)

    out = jax.block_until_ready(down_forward(x, w1, s1, b1, w2, s2, b2))
    ref = jax.block_until_ready(reference(x, raw))

    assert out.shape == (N, Cout, H // 2, W // 2), out.shape
    assert jnp.allclose(out, ref, rtol=2e-3, atol=2e-3), (
        float(jnp.max(jnp.abs(out - ref))))

    print("KERNEL_OK")
</pallas_src>

<mosaic_0001>
module attributes {stable_mosaic.version = 11 : i64} {
  func.func @down_kernel(%arg0: i32, %arg1: memref<2x4x8x32xbf16, #tpu.memory_space<vmem>>, %arg2: memref<3x32x64xbf16, #tpu.memory_space<vmem>>, %arg3: memref<1x64xf32, #tpu.memory_space<vmem>>, %arg4: memref<3x64x64xbf16, #tpu.memory_space<vmem>>, %arg5: memref<1x64xf32, #tpu.memory_space<vmem>>, %arg6: memref<2x8x64xf32, #tpu.memory_space<vmem>>) attributes {dimension_semantics = [#tpu.dimension_semantics<parallel>], iteration_bounds = array<i64: 1>, scalar_prefetch = 0 : i64, scratch_operands = 0 : i64, tpu.core_type = #tpu.core_type<tc>, window_params = [{transform_indices = @transform_0, window_bounds = array<i64: 2, 4, 8, 32>}, {pipeline_mode = #tpu.pipeline_mode<synchronous>, transform_indices = @transform_1, window_bounds = array<i64: 3, 32, 64>}, {pipeline_mode = #tpu.pipeline_mode<synchronous>, transform_indices = @transform_2, window_bounds = array<i64: 1, 64>}, {pipeline_mode = #tpu.pipeline_mode<synchronous>, transform_indices = @transform_3, window_bounds = array<i64: 3, 64, 64>}, {pipeline_mode = #tpu.pipeline_mode<synchronous>, transform_indices = @transform_4, window_bounds = array<i64: 1, 64>}, {transform_indices = @transform_5, window_bounds = array<i64: 2, 8, 64>}]} {
    %c0 = arith.constant 0 : index
    %c0_0 = arith.constant 0 : index
    %c0_1 = arith.constant 0 : index
    %c0_2 = arith.constant 0 : index
    %0 = vector.load %arg1[%c0, %c0_0, %c0_1, %c0_2] : memref<2x4x8x32xbf16, #tpu.memory_space<vmem>>, vector<2x4x8x32xbf16>
    %cst = arith.constant dense<0xFF80> : vector<2x8x32xbf16>
    %1 = vector.multi_reduction <maximumf>, %0, %cst [1] : vector<2x4x8x32xbf16> to vector<2x8x32xbf16>
    %cst_3 = arith.constant 0.000000e+00 : bf16
    %2 = vector.broadcast %cst_3 : bf16 to vector<2x1x32xbf16>
    %3 = vector.extract_strided_slice %1 {offsets = [0, 0, 0], sizes = [2, 7, 32], strides = [1, 1, 1]} : vector<2x8x32xbf16> to vector<2x7x32xbf16>
    %4 = tpu.concatenate %2, %3 in 1 : vector<2x1x32xbf16>, vector<2x7x32xbf16> -> vector<2x8x32xbf16>
    %5 = vector.extract_strided_slice %1 {offsets = [0, 1, 0], sizes = [2, 7, 32], strides = [1, 1, 1]} : vector<2x8x32xbf16> to vector<2x7x32xbf16>
    %6 = tpu.concatenate %5, %2 in 1 : vector<2x7x32xbf16>, vector<2x1x32xbf16> -> vector<2x8x32xbf16>
    %7 = vector.shape_cast %4 : vector<2x8x32xbf16> to vector<16x32xbf16>
    %c0_4 = arith.constant 0 : index
    %c0_5 = arith.constant 0 : index
    %c0_6 = arith.constant 0 : index
    %8 = vector.load %arg2[%c0_4, %c0_5, %c0_6] : memref<3x32x64xbf16, #tpu.memory_space<vmem>>, vector<1x32x64xbf16>
    %9 = vector.shape_cast %8 : vector<1x32x64xbf16> to vector<32x64xbf16>
    %cst_7 = arith.constant dense<0.000000e+00> : vector<16x64xf32>
    %10 = tpu.matmul %7, %9, %cst_7 {dimension_numbers = #tpu.dot_dimension_numbers<[1], [0], [0], [1], [0, 0, 1, 1], [], []>} : vector<16x32xbf16>, vector<32x64xbf16>, vector<16x64xf32> -> vector<16x64xf32>
    %11 = vector.shape_cast %1 : vector<2x8x32xbf16> to vector<16x32xbf16>
    %c1 = arith.constant 1 : index
    %c0_8 = arith.constant 0 : index
    %c0_9 = arith.constant 0 : index
    %12 = vector.load %arg2[%c1, %c0_8, %c0_9] : memref<3x32x64xbf16, #tpu.memory_space<vmem>>, vector<1x32x64xbf16>
    %13 = vector.shape_cast %12 : vector<1x32x64xbf16> to vector<32x64xbf16>
    %cst_10 = arith.constant dense<0.000000e+00> : vector<16x64xf32>
    %14 = tpu.matmul %11, %13, %cst_10 {dimension_numbers = #tpu.dot_dimension_numbers<[1], [0], [0], [1], [0, 0, 1, 1], [], []>} : vector<16x32xbf16>, vector<32x64xbf16>, vector<16x64xf32> -> vector<16x64xf32>
    %15 = arith.addf %10, %14 : vector<16x64xf32>
    %16 = vector.shape_cast %6 : vector<2x8x32xbf16> to vector<16x32xbf16>
    %c2 = arith.constant 2 : index
    %c0_11 = arith.constant 0 : index
    %c0_12 = arith.constant 0 : index
    %17 = vector.load %arg2[%c2, %c0_11, %c0_12] : memref<3x32x64xbf16, #tpu.memory_space<vmem>>, vector<1x32x64xbf16>
    %18 = vector.shape_cast %17 : vector<1x32x64xbf16> to vector<32x64xbf16>
    %cst_13 = arith.constant dense<0.000000e+00> : vector<16x64xf32>
    %19 = tpu.matmul %16, %18, %cst_13 {dimension_numbers = #tpu.dot_dimension_numbers<[1], [0], [0], [1], [0, 0, 1, 1], [], []>} : vector<16x32xbf16>, vector<32x64xbf16>, vector<16x64xf32> -> vector<16x64xf32>
    %20 = arith.addf %15, %19 : vector<16x64xf32>
    %c0_14 = arith.constant 0 : index
    %c0_15 = arith.constant 0 : index
    %21 = vector.load %arg3[%c0_14, %c0_15] : memref<1x64xf32, #tpu.memory_space<vmem>>, vector<1x64xf32>
    %22 = vector.broadcast %21 : vector<1x64xf32> to vector<16x64xf32>
    %23 = arith.addf %20, %22 : vector<16x64xf32>
    %cst_16 = arith.constant 0.000000e+00 : f32
    %24 = vector.broadcast %cst_16 : f32 to vector<16x64xf32>
    %25 = arith.maximumf %23, %24 : vector<16x64xf32>
    %26 = arith.truncf %25 : vector<16x64xf32> to vector<16x64xbf16>
    %27 = vector.shape_cast %26 : vector<16x64xbf16> to vector<2x8x64xbf16>
    %cst_17 = arith.constant 0.000000e+00 : bf16
    %28 = vector.broadcast %cst_17 : bf16 to vector<2x1x64xbf16>
    %29 = vector.extract_strided_slice %27 {offsets = [0, 0, 0], sizes = [2, 7, 64], strides = [1, 1, 1]} : vector<2x8x64xbf16> to vector<2x7x64xbf16>
    %30 = tpu.concatenate %28, %29 in 1 : vector<2x1x64xbf16>, vector<2x7x64xbf16> -> vector<2x8x64xbf16>
    %31 = vector.extract_strided_slice %27 {offsets = [0, 1, 0], sizes = [2, 7, 64], strides = [1, 1, 1]} : vector<2x8x64xbf16> to vector<2x7x64xbf16>
    %32 = tpu.concatenate %31, %28 in 1 : vector<2x7x64xbf16>, vector<2x1x64xbf16> -> vector<2x8x64xbf16>
    %33 = vector.shape_cast %30 : vector<2x8x64xbf16> to vector<16x64xbf16>
    %c0_18 = arith.constant 0 : index
    %c0_19 = arith.constant 0 : index
    %c0_20 = arith.constant 0 : index
    %34 = vector.load %arg4[%c0_18, %c0_19, %c0_20] : memref<3x64x64xbf16, #tpu.memory_space<vmem>>, vector<1x64x64xbf16>
    %35 = vector.shape_cast %34 : vector<1x64x64xbf16> to vector<64x64xbf16>
    %cst_21 = arith.constant dense<0.000000e+00> : vector<16x64xf32>
    %36 = tpu.matmul %33, %35, %cst_21 {dimension_numbers = #tpu.dot_dimension_numbers<[1], [0], [0], [1], [0, 0, 1, 1], [], []>} : vector<16x64xbf16>, vector<64x64xbf16>, vector<16x64xf32> -> vector<16x64xf32>
    %37 = vector.shape_cast %27 : vector<2x8x64xbf16> to vector<16x64xbf16>
    %c1_22 = arith.constant 1 : index
    %c0_23 = arith.constant 0 : index
    %c0_24 = arith.constant 0 : index
    %38 = vector.load %arg4[%c1_22, %c0_23, %c0_24] : memref<3x64x64xbf16, #tpu.memory_space<vmem>>, vector<1x64x64xbf16>
    %39 = vector.shape_cast %38 : vector<1x64x64xbf16> to vector<64x64xbf16>
    %cst_25 = arith.constant dense<0.000000e+00> : vector<16x64xf32>
    %40 = tpu.matmul %37, %39, %cst_25 {dimension_numbers = #tpu.dot_dimension_numbers<[1], [0], [0], [1], [0, 0, 1, 1], [], []>} : vector<16x64xbf16>, vector<64x64xbf16>, vector<16x64xf32> -> vector<16x64xf32>
    %41 = arith.addf %36, %40 : vector<16x64xf32>
    %42 = vector.shape_cast %32 : vector<2x8x64xbf16> to vector<16x64xbf16>
    %c2_26 = arith.constant 2 : index
    %c0_27 = arith.constant 0 : index
    %c0_28 = arith.constant 0 : index
    %43 = vector.load %arg4[%c2_26, %c0_27, %c0_28] : memref<3x64x64xbf16, #tpu.memory_space<vmem>>, vector<1x64x64xbf16>
    %44 = vector.shape_cast %43 : vector<1x64x64xbf16> to vector<64x64xbf16>
    %cst_29 = arith.constant dense<0.000000e+00> : vector<16x64xf32>
    %45 = tpu.matmul %42, %44, %cst_29 {dimension_numbers = #tpu.dot_dimension_numbers<[1], [0], [0], [1], [0, 0, 1, 1], [], []>} : vector<16x64xbf16>, vector<64x64xbf16>, vector<16x64xf32> -> vector<16x64xf32>
    %46 = arith.addf %41, %45 : vector<16x64xf32>
    %c0_30 = arith.constant 0 : index
    %c0_31 = arith.constant 0 : index
    %47 = vector.load %arg5[%c0_30, %c0_31] : memref<1x64xf32, #tpu.memory_space<vmem>>, vector<1x64xf32>
    %48 = vector.broadcast %47 : vector<1x64xf32> to vector<16x64xf32>
    %49 = arith.addf %46, %48 : vector<16x64xf32>
    %cst_32 = arith.constant 0.000000e+00 : f32
    %50 = vector.broadcast %cst_32 : f32 to vector<16x64xf32>
    %51 = arith.maximumf %49, %50 : vector<16x64xf32>
    %52 = vector.shape_cast %51 : vector<16x64xf32> to vector<2x8x64xf32>
    %c0_33 = arith.constant 0 : index
    %c0_34 = arith.constant 0 : index
    %c0_35 = arith.constant 0 : index
    %53 = vector.load %arg6[%c0_33, %c0_34, %c0_35] : memref<2x8x64xf32, #tpu.memory_space<vmem>>, vector<2x8x64xf32>
    tpu.vector_store %arg6[%c0_33, %c0_34, %c0_35], %52 {strides = array<i32>} : memref<2x8x64xf32, #tpu.memory_space<vmem>>, vector<2x8x64xf32>,
    return
  }
  func.func @transform_0(%arg0: i32) -> (i32, i32, i32, i32) {
    %c0_i32 = arith.constant 0 : i32
    %c0_i32_0 = arith.constant 0 : i32
    %c0_i32_1 = arith.constant 0 : i32
    %c0_i32_2 = arith.constant 0 : i32
    return %arg0, %c0_i32, %c0_i32_0, %c0_i32_1 : i32, i32, i32, i32
  }
  func.func @transform_1(%arg0: i32) -> (i32, i32, i32) {
    %c0_i32 = arith.constant 0 : i32
    %c0_i32_0 = arith.constant 0 : i32
    %c0_i32_1 = arith.constant 0 : i32
    %c0_i32_2 = arith.constant 0 : i32
    return %c0_i32, %c0_i32_0, %c0_i32_1 : i32, i32, i32
  }
  func.func @transform_2(%arg0: i32) -> (i32, i32) {
    %c0_i32 = arith.constant 0 : i32
    %c0_i32_0 = arith.constant 0 : i32
    %c0_i32_1 = arith.constant 0 : i32
    return %c0_i32, %c0_i32_0 : i32, i32
  }
  func.func @transform_3(%arg0: i32) -> (i32, i32, i32) {
    %c0_i32 = arith.constant 0 : i32
    %c0_i32_0 = arith.constant 0 : i32
    %c0_i32_1 = arith.constant 0 : i32
    %c0_i32_2 = arith.constant 0 : i32
    return %c0_i32, %c0_i32_0, %c0_i32_1 : i32, i32, i32
  }
  func.func @transform_4(%arg0: i32) -> (i32, i32) {
    %c0_i32 = arith.constant 0 : i32
    %c0_i32_0 = arith.constant 0 : i32
    %c0_i32_1 = arith.constant 0 : i32
    return %c0_i32, %c0_i32_0 : i32, i32
  }
  func.func @transform_5(%arg0: i32) -> (i32, i32, i32) {
    %c0_i32 = arith.constant 0 : i32
    %c0_i32_0 = arith.constant 0 : i32
    %c0_i32_1 = arith.constant 0 : i32
    return %arg0, %c0_i32, %c0_i32_0 : i32, i32, i32
  }
}

</mosaic_0001>

<bundles_post_ra>
// kernel: tpu_custom_call.1
= control target key start
LH: loop header
LB: loop body
LE: loop exit
PB: predicated region body
PF: predicated region fallthrough
CT: control target
= control target key end

     0   :  { %10 = vsyncpa [#allocation3], 0  ;;  %s1020_s0 = inlined_call_operand.hbm [shape: bf16[2,4,8,32], index: 0, kind: input, shape index: {}]   ;;  %s1021_s1 = inlined_call_operand.hbm [shape: bf16[3,32,64], index: 1, kind: input, shape index: {}]   ;;  %s1022_s2 = inlined_call_operand.vmem [shape: f32[1,64], index: 2, kind: input, shape index: {}]   ;;  %s1023_s3 = inlined_call_operand.hbm [shape: bf16[3,64,64], index: 3, kind: input, shape index: {}]   ;;  %s1024_s4 = inlined_call_operand.vmem [shape: f32[1,64], index: 4, kind: input, shape index: {}]   ;;  %s1025_s5 = inlined_call_operand.hbm [shape: f32[2,8,64], index: 5, kind: output, shape index: {}]  }
   0x1   :  { %11 = vsyncpa [#allocation6], 0 }
   0x2   :  { %12 = vsyncpa [#allocation4], 0  ;;  %s890_s18 = smov [#allocation5]   ;;  %s891_s20 = smov [#allocation2]  }
   0x3   :  { %s30_s19 = sshll.u32 %s890_s18, 4  ;;  %s18_s21 = sshll.u32 %s891_s20, 4  ;;  %s31_s19 = int_to_ptr.vmem [resolvable:$true] %s30_s19  ;;  %s19_s21 = int_to_ptr.vmem [resolvable:$true] %s18_s21 }
   0x4   :  { %s812_s22 = scalar_lea.vmem %s31_s19, 768  ;;  %p817_p1 = scmp.lt.s32.totalorder %s31_s19, %s31_s19 }
   0x5   :  { %p813_p0 = scmp.ne.s32.totalorder %s31_s19, %s812_s22  ;;  %p818_p2 = scmp.lt.s32.totalorder %s812_s22, %s812_s22 }
   0x7   :  { %p819_p3 = por %p818_p2, %p817_p1 }
   0x9   :  { %p820_p4 = pnand %p819_p3, %p813_p0 }
   0xb   :  { %823 = shalt.err (!%p820_p4)
}
   0xc   :  { %s892_s23 = smov 64   ;;  %s893_s24 = smov 4  }
   0xd   :  { %36 = dma.hbm_to_vmem [thread:$0]  %s1021_s1, 768, %s31_s19, [#allocation6], %s892_s23, %s892_s23, %s893_s24  }
   0xe   :  { %s832_s27 = scalar_lea.vmem %s19_s21, 512  ;;  %p837_p6 = scmp.lt.s32.totalorder %s19_s21, %s19_s21 }
   0xf   :  { %p833_p5 = scmp.ne.s32.totalorder %s19_s21, %s832_s27  ;;  %p838_p7 = scmp.lt.s32.totalorder %s832_s27, %s832_s27 }
  0x11   :  { %p839_p8 = por %p838_p7, %p837_p6 }
  0x13   :  { %p840_p9 = pnand %p839_p8, %p833_p5 }
  0x15   :  { %843 = shalt.err (!%p840_p9)
}
  0x16   :  { %24 = dma.hbm_to_vmem [thread:$0]  %s1020_s0, 512, %s19_s21, [#allocation3], %s892_s23, %s892_s23, %s893_s24  }
  0x17   :  { %s894_s30 = smov [#allocation7]  }
  0x18   :  { %s44_s6 = sshll.u32 %s894_s30, 4  ;;  %s45_s6 = int_to_ptr.vmem [resolvable:$true] %s44_s6 }
  0x19   :  { %s852_s7 = scalar_lea.vmem %s45_s6, 1536  ;;  %p857_p11 = scmp.lt.s32.totalorder %s45_s6, %s45_s6 }
  0x1a   :  { %p853_p10 = scmp.ne.s32.totalorder %s45_s6, %s852_s7  ;;  %p858_p12 = scmp.lt.s32.totalorder %s852_s7, %s852_s7 }
  0x1c   :  { %p859_p13 = por %p858_p12, %p857_p11 }
  0x1e   :  { %p860_p0 = pnand %p859_p13, %p853_p10 }
  0x20   :  { %863 = shalt.err (!%p860_p0)
}
  0x21   :  { %50 = dma.hbm_to_vmem [thread:$0]  %s1023_s3, 1536, %s45_s6, [#allocation6], %s892_s23, %s892_s23, %s893_s24  }
  0x22   :  { %884 = dma.done.wait [#allocation3], 512  }
  0x23   :  { %885 = vsyncadd [#allocation3], 4294966784 }
  0x24   :  { %886 = dma.done.wait [#allocation6], 2304  }
  0x25   :  { %887 = vsyncadd [#allocation6], 4294964992  ;;  %v895_v0 = vmov 0.0   ;;  %vm896_vm0 = vmmov 0   ;;  %v786_v1 = vld [vmem:[#allocation5 + $0x18] sm:$0xff]   ;;  %v787_v2 = vld [vmem:[#allocation5 + $0x10] sm:$0xff]  }
  0x26   :  { %716 = vmatprep.subr.bf16.mxu0 %v895_v0  ;;  %720 = vmatprep.mubr.msk.bf16.mxu0 %vm896_vm0, %v895_v0  ;;  %vm72_vm1 = vcmask 257024   ;;  %vm127_vm2 = vsmask.f32 256  ;;  %v64_v3 = vld [vmem:[#allocation2] sm:$0xf]  ;;  %v788_v24 = vld [vmem:[#allocation5 + $0x8] sm:$0xff]  }
  0x27   :  { %724 = vmatprep.subr.bf16.mxu1 %v895_v0  ;;  %728 = vmatprep.mubr.msk.bf16.mxu1 %vm896_vm0, %v895_v0  ;;  %v65_v4 = vld [vmem:[#allocation2 + $0x4] sm:$0xf]  ;;  %v66_v5 = vld [vmem:[#allocation2 + $0x8] sm:$0xf]  ;;  %v67_v6 = vld [vmem:[#allocation2 + $0xc] sm:$0xf] }
  0x28   :  { %717 = vmatpush3.bf16.msra.mxu0 %v786_v1  ;;  %v68_v7 = vld [vmem:[#allocation2 + $0x10] sm:$0xf]  ;;  %v69_v8 = vld [vmem:[#allocation2 + $0x14] sm:$0xf]  ;;  %v70_v9 = vld [vmem:[#allocation2 + $0x18] sm:$0xf]  ;;  %725 = vmatpush3.bf16.msra.mxu1 %v788_v24 }
  0x29   :  { %718 = vmatprep.subr.bf16.mxu0 %v895_v0  ;;  %v71_v10 = vld [vmem:[#allocation2 + $0x1c] sm:$0xf]  ;;  %v75_v11 = vsel %vm72_vm1, %v64_v3, 4286644096  ;;  %v78_v12 = vsel %vm72_vm1, %v65_v4, 4286644096  ;;  %726 = vmatprep.subr.bf16.mxu1 %v895_v0 }
  0x2a   :  { %v81_v13 = vsel %vm72_vm1, %v66_v5, 4286644096  ;;  %v85_v14 = vsel %vm72_vm1, %v67_v6, 4286644096  ;;  %v90_v17 = vsel %vm72_vm1, %v68_v7, 4286644096 }
  0x2b   :  { %v83_v15 = vmax.bf16 %v81_v13, %v75_v11  ;;  %v87_v16 = vmax.bf16 %v85_v14, %v78_v12  ;;  %v93_v18 = vsel %vm72_vm1, %v69_v8, 4286644096  ;;  %v96_v19 = vsel %vm72_vm1, %v70_v9, 4286644096  ;;  %v790_v27 = vld [vmem:[#allocation5] sm:$0xff]   ;;  %v789_v28 = vld [vmem:[#allocation5 + $0x28] sm:$0xff]  }
  0x2c   :  { %719 = vmatpush3.bf16.msra.mxu0 %v787_v2  ;;  %v100_v20 = vsel %vm72_vm1, %v71_v10, 4286644096  ;;  %v98_v22 = vmax.bf16 %v96_v19, %v90_v17  ;;  %vm126_vm3 = vcmask 1040384   ;;  %vm138_vm4 = vsmask.f32 3328  ;;  %v791_v34 = vld [vmem:[#allocation5 + $0x20] sm:$0xff]   ;;  %727 = vmatpush3.bf16.msra.mxu1 %v790_v27 }
  0x2d   :  { %732 = vmatprep.subr.bf16.mxu0 %v895_v0  ;;  %v88_v21 = vmax.bf16 %v87_v16, %v83_v15  ;;  %v102_v23 = vmax.bf16 %v100_v20, %v93_v18  ;;  %vm164_vm5 = vcmask 261120   ;;  %vm137_vm6 = vcmask 1043456   ;;  %vm957_vm7 = vmand %vm126_vm3, %vm127_vm2  ;;  %740 = vmatprep.subr.bf16.mxu1 %v895_v0  ;;  %v792_v52 = vld [vmem:[#allocation7 + $0x38] sm:$0xff]   ;;  %v793_v53 = vld [vmem:[#allocation7 + $0x30] sm:$0xff]   ;;  %s897_s10 = smov [#allocation8]  }
  0x2e   :  { %vm963_vm8 = vmand %vm137_vm6, %vm138_vm4  ;;  %v794_v54 = vld [vmem:[#allocation7 + $0x28] sm:$0xff]   ;;  %v795_v55 = vld [vmem:[#allocation7 + $0x18] sm:$0xff]   ;;  %vm422_vm9 = vcmask 523264   ;;  %s642_s11 = sshll.u32 %s897_s10, 4  ;;  %s643_s11 = int_to_ptr.vmem [resolvable:$true] %s642_s11 }
  0x2f   :  { %v103_v25 = vmax.bf16 %v102_v23, %v98_v22  ;;  %v655_v26 = vcombine.low %v88_v21, %v88_v21  ;;  %v796_v56 = vld [vmem:[#allocation7 + $0x20] sm:$0xff]   ;;  %v797_v57 = vld [vmem:[#allocation7 + $0x10] sm:$0xff]   ;;  %v799_v58 = vld [vmem:[#allocation7 + $0x8] sm:$0xff]   ;;  %s864_s12 = scalar_lea.vmem %s643_s11, 256  ;;  %p869_p2 = scmp.lt.s32.totalorder %s643_s11, %s643_s11 }
  0x30   :  { %v801_v59 = vld [vmem:[#allocation7] sm:$0xff]   ;;  %v669_v4 = vld [vmem:[%s1022_s2] ss:$0 sm:$0xff]  ;;  %v798_v20 = vld [vmem:[#allocation7 + $0x58] sm:$0xff]   ;;  %p865_p1 = scmp.ne.s32.totalorder %s643_s11, %s864_s12  ;;  %p870_p3 = scmp.lt.s32.totalorder %s864_s12, %s864_s12 }
  0x31   :  { %v656_v29 = vcombine.low %v103_v25, %v103_v25  ;;  %v111_v30 = vshrl.u32 %v655_v26, 16  ;;  %v657_v31 = vcombine.low %v88_v21, %v103_v25  ;;  %v114_v32 = vshll.u32 %v655_v26, 16  ;;  %v800_v27 = vld [vmem:[#allocation7 + $0x50] sm:$0xff]  }
  0x32   :  { %p871_p4 = por %p870_p3, %p869_p2 }
  0x33   :  { %v118_v35 = vshrl.u32 %v656_v29, 16  ;;  %721 = vmatmul.mubr.msk.bf16.vlgmr.msra.gmra.mxu0 %vm164_vm5, %v657_v31  ;;  %v113_v36 = vrot.slane %v111_v30, 7  ;;  %v121_v37 = vshll.u32 %v656_v29, 16  ;;  %v131_v38 = vrot.slane %v114_v32, 1 }
  0x34   :  { %733 = vmatpush3.bf16.msra.mxu0 %v789_v28  ;;  %736 = vmatprep.mubr.msk.bf16.mxu0 %vm896_vm0, %v895_v0  ;;  %p872_p5 = pnand %p871_p4, %p865_p1 }
  0x35   :  { %734 = vmatprep.subr.bf16.mxu0 %v895_v0  ;;  %v116_v40 = vor.u32 %v114_v32, %v113_v36  ;;  %v120_v41 = vrot.slane %v118_v35, 7  ;;  %v133_v42 = vrot.slane %v121_v37, 1  ;;  %v132_v43 = vor.u32 %v131_v38, %v111_v30 }
  0x37   :  { %v123_v44 = vor.u32 %v121_v37, %v120_v41  ;;  %v129_v45 = vsel %vm957_vm7, 0, %v116_v40  ;;  %v134_v46 = vor.u32 %v133_v42, %v118_v35  ;;  %v140_v47 = vsel %vm963_vm8, %v132_v43, 0  ;;  %v803_v41 = vld [vmem:[#allocation7 + $0x40] sm:$0xff]  }
  0x38   :  { %735 = vmatpush3.bf16.msra.mxu0 %v791_v34  ;;  %v802_v34 = vld [vmem:[#allocation7 + $0x48] sm:$0xff]  }
  0x39   :  { %v130_v48 = vsel %vm957_vm7, 0, %v123_v44  ;;  %v141_v49 = vsel %vm963_vm8, %v134_v46, 0  ;;  %752 = vmatprep.subr.bf16.mxu0 %v895_v0 }
  0x3a   :  { %v661_v50 = vcombine.low %v129_v45, %v130_v48  ;;  %v665_v51 = vcombine.low %v140_v47, %v141_v49 }
  0x3c   :  { %729 = vmatmul.mubr.msk.bf16.vlgmr.msra.gmra.mxu1 %vm164_vm5, %v661_v50  ;;  %737 = vmatmul.mubr.msk.bf16.vlgmr.msra.gmra.mxu0 %vm164_vm5, %v665_v51 }
  0x3d   :  { %748 = vmatprep.mubr.msk.bf16.mxu1 %vm896_vm0, %v895_v0  ;;  %760 = vmatprep.mubr.msk.bf16.mxu0 %vm896_vm0, %v895_v0 }
  0x3e   :  { %741 = vmatpush3.bf16.msra.mxu1 %v792_v52  ;;  %753 = vmatpush3.bf16.msra.mxu0 %v795_v55 }
  0x3f   :  { %742 = vmatprep.subr.bf16.mxu1 %v895_v0  ;;  %754 = vmatprep.subr.bf16.mxu0 %v895_v0 }
  0x42   :  { %743 = vmatpush3.bf16.msra.mxu1 %v793_v53  ;;  %755 = vmatpush3.bf16.msra.mxu0 %v797_v57  ;;  %v689_v53 = vld [vmem:[%s1024_s4] ss:$0 sm:$0xff] }
  0x43   :  { %744 = vmatprep.subr.bf16.mxu1 %v895_v0  ;;  %756 = vmatprep.subr.bf16.mxu0 %v895_v0 }
  0x46   :  { %745 = vmatpush3.bf16.msra.mxu1 %v794_v54  ;;  %757 = vmatpush3.bf16.msra.mxu0 %v799_v58 }
  0x47   :  { %746 = vmatprep.subr.bf16.mxu1 %v895_v0  ;;  %758 = vmatprep.subr.bf16.mxu0 %v895_v0 }
  0x4a   :  { %747 = vmatpush3.bf16.msra.mxu1 %v796_v56  ;;  %759 = vmatpush3.bf16.msra.mxu0 %v801_v59 }
  0x4b   :  { %764 = vmatprep.subr.bf16.mxu1 %v895_v0 }
  0xf3   :  { %v202_v60 = vpop.f32.mrf.mxu0 }
  0xf5   :  { %v722_v61 = vpop.f32.mrf.mxu0 }
  0xf7   :  { %v205_v62 = vpop.f32.mrf.mxu0 }
  0xf9   :  { %v723_v63 = vpop.f32.mrf.mxu0 }
  0xfc   :  { %v263_v1 = vpop.f32.mrf.mxu1  ;;  %v329_v2 = vpop.f32.mrf.mxu0 }
  0xfd   :  { %v264_v3 = vadd.f32 %v263_v1, %v202_v60 }
  0xfe   :  { %v730_v5 = vpop.f32.mrf.mxu1  ;;  %v738_v6 = vpop.f32.mrf.mxu0 }
  0xff   :  { %v336_v7 = vadd.f32 %v329_v2, %v264_v3 }
 0x100   :  { %v266_v8 = vpop.f32.mrf.mxu1  ;;  %v332_v9 = vpop.f32.mrf.mxu0 }
 0x101   :  { %v345_v10 = vadd.f32 %v669_v4, %v336_v7  ;;  %v267_v11 = vadd.f32 %v266_v8, %v205_v62 }
 0x102   :  { %v731_v12 = vpop.f32.mrf.mxu1  ;;  %v739_v13 = vpop.f32.mrf.mxu0 }
 0x103   :  { %v347_v14 = vmax.f32 %v345_v10, 0.0  ;;  %v337_v15 = vadd.f32 %v332_v9, %v267_v11 }
 0x105   :  { %v690_v16 = vpack.c.bf16 %v347_v14, %v347_v14  ;;  %v346_v17 = vadd.f32 %v669_v4, %v337_v15 }
 0x107   :  { %v356_v18 = vshrl.u32 %v690_v16, 16  ;;  %v348_v19 = vmax.f32 %v346_v17, 0.0  ;;  %v359_v24 = vshll.u32 %v690_v16, 16 }
 0x109   :  { %v358_v21 = vrot.slane %v356_v18, 7  ;;  %v349_v22 = vpack.c.bf16 %v348_v19, %v347_v14  ;;  %v691_v23 = vpack.c.bf16 %v348_v19, %v348_v19  ;;  %v373_v32 = vrot.slane %v359_v24, 1 }
 0x10b   :  { %v363_v25 = vshrl.u32 %v691_v23, 16  ;;  %v366_v26 = vshll.u32 %v691_v23, 16  ;;  %749 = vmatmul.mubr.msk.bf16.vlgmr.msra.gmra.mxu1 %vm422_vm9, %v349_v22  ;;  %v361_v28 = vor.u32 %v359_v24, %v358_v21  ;;  %v374_v40 = vor.u32 %v373_v32, %v356_v18 }
 0x10c   :  { %765 = vmatpush3.bf16.msra.mxu1 %v798_v20  ;;  %772 = vmatprep.mubr.msk.bf16.mxu1 %vm896_vm0, %v895_v0 }
 0x10d   :  { %v365_v29 = vrot.slane %v363_v25, 7  ;;  %766 = vmatprep.subr.bf16.mxu1 %v895_v0  ;;  %v375_v30 = vrot.slane %v366_v26, 1  ;;  %v371_v35 = vsel %vm957_vm7, 0, %v361_v28  ;;  %v379_v43 = vsel %vm963_vm8, %v374_v40, 0 }
 0x10f   :  { %v368_v31 = vor.u32 %v366_v26, %v365_v29  ;;  %v376_v37 = vor.u32 %v375_v30, %v363_v25 }
 0x110   :  { %767 = vmatpush3.bf16.msra.mxu1 %v800_v27 }
 0x111   :  { %v372_v36 = vsel %vm957_vm7, 0, %v368_v31  ;;  %768 = vmatprep.subr.bf16.mxu1 %v895_v0  ;;  %v380_v42 = vsel %vm963_vm8, %v376_v37, 0 }
 0x112   :  { %v677_v38 = vcombine.low %v371_v35, %v372_v36  ;;  %v683_v33 = vcombine.low %v379_v43, %v380_v42 }
 0x114   :  { %769 = vmatpush3.bf16.msra.mxu1 %v802_v34  ;;  %761 = vmatmul.mubr.msk.bf16.vlgmr.msra.gmra.mxu0 %vm422_vm9, %v677_v38 }
 0x115   :  { %770 = vmatprep.subr.bf16.mxu1 %v895_v0 }
 0x118   :  { %771 = vmatpush3.bf16.msra.mxu1 %v803_v41 }
 0x11b   :  { %773 = vmatmul.mubr.msk.bf16.vlgmr.msra.gmra.mxu1 %vm422_vm9, %v683_v33 }
 0x1cb   :  { %v460_v44 = vpop.f32.mrf.mxu1 }
 0x1cd   :  { %v750_v45 = vpop.f32.mrf.mxu1 }
 0x1cf   :  { %v463_v46 = vpop.f32.mrf.mxu1 }
 0x1d1   :  { %v751_v47 = vpop.f32.mrf.mxu1 }
 0x1d4   :  { %v533_v48 = vpop.f32.mrf.mxu0 }
 0x1d5   :  { %v534_v51 = vadd.f32 %v533_v48, %v460_v44 }
 0x1d6   :  { %v762_v49 = vpop.f32.mrf.mxu0 }
 0x1d8   :  { %v536_v50 = vpop.f32.mrf.mxu0 }
 0x1d9   :  { %v537_v55 = vadd.f32 %v536_v50, %v463_v46 }
 0x1da   :  { %v763_v52 = vpop.f32.mrf.mxu0 }
 0x1db   :  { %v615_v0 = vpop.f32.mrf.mxu1 }
 0x1dc   :  { %v622_v39 = vadd.f32 %v615_v0, %v534_v51 }
 0x1dd   :  { %v774_v54 = vpop.f32.mrf.mxu1 }
 0x1de   :  { %v631_v56 = vadd.f32 %v689_v53, %v622_v39 }
 0x1df   :  { %v618_v57 = vpop.f32.mrf.mxu1 }
 0x1e0   :  { %v633_v58 = vmax.f32 %v631_v56, 0.0  ;;  %v623_v59 = vadd.f32 %v618_v57, %v537_v55 }
 0x1e1   :  { %v775_v60 = vpop.f32.mrf.mxu1 }
 0x1e2   :  { %635 = vst.msk [vmem:[#allocation8] sm:$0xff] %vm422_vm9, %v633_v58  ;;  %v632_v61 = vadd.f32 %v689_v53, %v623_v59 }
 0x1e4   :  { %v634_v62 = vmax.f32 %v632_v61, 0.0 }
 0x1e6   :  { %636 = vst.msk [vmem:[#allocation8 + $0x8] sm:$0xff] %vm422_vm9, %v634_v62 }
 0x1e7   :  { %875 = shalt.err (!%p872_p5)
}
 0x1e8   :  { %s898_s4 = smov 128   ;;  %s899_s13 = smov 8  }
 0x1e9   :  { %648 = dma.vmem_to_hbm [thread:$0]  %s643_s11, 256, %s1025_s5, [#allocation4], %s898_s4, %s898_s4, %s899_s13  }
 0x1ea   :  { %888 = dma.done.wait [#allocation4], 256  }
 0x1eb   :  { %889 = vsyncadd [#allocation4], 4294967040 }
 0x1ec   :  { %652 = vsyncpa [#allocation3], 1 }
 0x1ed   :  { %653 = vsyncpa [#allocation6], 1 }
 0x1ee   :  { %654 = vsyncpa [#allocation4], 1 }

</bundles_post_ra>
